<compile_context>
chip_gen: v7x
topology: tpu7x:2x2x1
jax: 0.10.0
libtpu: 0.0.40
codegen_flags: <defaults>
</compile_context>

<pallas_src>
import functools

import jax
import jax.numpy as jnp
import numpy as np
from jax import lax
from jax.experimental import pallas as pl
from jax.experimental.pallas import tpu as pltpu


def _round_up(n, m):
    return ((n + m - 1) // m) * m


def mlp_kernel(x_ref, w1_ref, b1_ref, w2_ref, b2_ref, w3_ref, b3_ref, o_ref,
               *, chunk, n_chunks):
    # Weights/biases are tiny -> load once per grid step, stay in vregs.
    w1 = w1_ref[...]
    b1 = b1_ref[...]
    w2 = w2_ref[...]
    b2 = b2_ref[...]
    w3 = w3_ref[...]
    b3 = b3_ref[...]

    def compute_chunk(c, carry):
        r = pl.multiple_of(c * chunk, chunk)
        x = x_ref[pl.ds(r, chunk), :]
        # fc1 -> ReLU
        h1 = jnp.maximum(
            jnp.dot(x, w1, preferred_element_type=jnp.float32) + b1, 0.0)
        # fc2 -> ReLU
        h2 = jnp.maximum(
            jnp.dot(h1, w2, preferred_element_type=jnp.float32) + b2, 0.0)
        # out (no activation)
        o_ref[pl.ds(r, chunk), :] = (
            jnp.dot(h2, w3, preferred_element_type=jnp.float32) + b3)
        return carry

    if n_chunks == 1:
        compute_chunk(0, None)
    else:
        # Sub-chunking bounds vreg pressure; unroll for LLO scheduler visibility.
        lax.fori_loop(0, n_chunks, compute_chunk, None,
                      unroll=(n_chunks <= 16))


def mlp_forward(x, w1, b1, w2, b2, w3, b3, *, batch_tile=2048, chunk_rows=256):
    """Fused 3-layer MLP forward in a single pallas_call.

    - Weights stay VMEM-resident (constant index_map).
    - Batch streamed in sublane-aligned tiles; >=2 grid steps when possible so
      v7x's second TensorCore gets work.
    - Output block last dim == out_features (no lane padding, no column slice).
    """
    B, f_in = x.shape
    h1 = w1.shape[1]
    h2 = w2.shape[1]
    out_features = w3.shape[1]

    # --- batch tile selection --------------------------------------------
    b8 = _round_up(B, 8)
    if b8 <= 8:
        tb = 8                                     # single minimal tile
    elif b8 <= 2 * batch_tile:
        tb = _round_up(-(-b8 // 2), 8)             # aim for exactly 2 steps (v7x)
    else:
        tb = batch_tile                            # stream in fixed tiles
    b_pad = _round_up(b8, tb)
    xp = jnp.pad(x, ((0, b_pad - B), (0, 0))) if b_pad != B else x

    # --- in-kernel sub-chunking (bound vreg pressure for big tiles) -------
    chunk = min(tb, chunk_rows)
    while tb % chunk != 0:                         # tb is a multiple of 8 -> terminates
        chunk -= 8
    n_chunks = tb // chunk

    # Weights/biases: full-array blocks, constant index_map -> VMEM-resident.
    resident = lambda a: pl.BlockSpec(a.shape, lambda i: (0,) * a.ndim)

    # --- cost estimate + VMEM budget --------------------------------------
    flops = 2 * b_pad * (f_in * h1 + h1 * h2 + h2 * out_features)
    weight_bytes = 4 * (w1.size + b1.size + w2.size + b2.size + w3.size + b3.size)
    bytes_accessed = 4 * (b_pad * f_in + b_pad * out_features) + weight_bytes
    cost = pl.CostEstimate(flops=flops, transcendentals=0,
                           bytes_accessed=bytes_accessed)

    # Double-buffered streamed tiles + (conservatively doubled) resident arrays.
    vmem_needed = 2 * 4 * tb * (f_in + out_features) + 2 * weight_bytes
    vmem_limit = None
    if vmem_needed > 12 * 1024 * 1024:             # v5e default scoped limit ~16 MiB
        vmem_limit = min(int(vmem_needed * 2), 128 * 1024 * 1024)

    kernel = functools.partial(mlp_kernel, chunk=chunk, n_chunks=n_chunks)

    out = pl.pallas_call(
        kernel,
        out_shape=jax.ShapeDtypeStruct((b_pad, out_features), jnp.float32),
        grid=(b_pad // tb,),
        in_specs=[
            pl.BlockSpec((tb, f_in), lambda i: (i, 0)),   # streamed activations
            resident(w1), resident(b1),
            resident(w2), resident(b2),
            resident(w3), resident(b3),
        ],
        out_specs=pl.BlockSpec((tb, out_features), lambda i: (i, 0)),
        cost_estimate=cost,
        compiler_params=pltpu.CompilerParams(
            dimension_semantics=("parallel",),            # v7x: shard batch over 2 TCs
            vmem_limit_bytes=vmem_limit),
    )(xp, w1, b1, w2, b2, w3, b3)

    # TODO(synk): for very large B on v5e, stream activations/output as bf16
    # (keep f32 MXU accumulation) to halve HBM traffic if tolerance allows.
    return out if b_pad == B else out[:B]


def init_linear(key, fan_in, fan_out):
    # Mimic PyTorch nn.Linear default init: U(-1/sqrt(fan_in), 1/sqrt(fan_in))
    kw, kb = jax.random.split(key)
    bound = 1.0 / np.sqrt(fan_in)
    w = jax.random.uniform(kw, (fan_in, fan_out), jnp.float32, -bound, bound)
    b = jax.random.uniform(kb, (1, fan_out), jnp.float32, -bound, bound)
    return w, b


if __name__ == "__main__":
    input_features, hidden_layer1, hidden_layer2, output_features = 4, 25, 30, 3
    batch = 8

    key = jax.random.PRNGKey(0)
    k_x, k1, k2, k3 = jax.random.split(key, 4)

    x = jax.random.normal(k_x, (batch, input_features), jnp.float32)
    w1, b1 = init_linear(k1, input_features, hidden_layer1)
    w2, b2 = init_linear(k2, hidden_layer1, hidden_layer2)
    w3, b3 = init_linear(k3, hidden_layer2, output_features)

    fwd = jax.jit(mlp_forward)
    out = fwd(x, w1, b1, w2, b2, w3, b3)
    out = jax.block_until_ready(out)

    # Reference check in plain JAX
    ref = jnp.maximum(x @ w1 + b1, 0.0)
    ref = jnp.maximum(ref @ w2 + b2, 0.0)
    ref = ref @ w3 + b3
    np.testing.assert_allclose(np.asarray(out), np.asarray(ref), rtol=1e-5, atol=1e-5)

    assert out.shape == (batch, output_features)
    print("KERNEL_OK")
</pallas_src>

<mosaic_0001>
module attributes {stable_mosaic.version = 11 : i64} {
  func.func @mlp_kernel(%arg0: i32, %arg1: memref<8x4xf32, #tpu.memory_space<vmem>>, %arg2: memref<4x25xf32, #tpu.memory_space<vmem>>, %arg3: memref<1x25xf32, #tpu.memory_space<vmem>>, %arg4: memref<25x30xf32, #tpu.memory_space<vmem>>, %arg5: memref<1x30xf32, #tpu.memory_space<vmem>>, %arg6: memref<30x3xf32, #tpu.memory_space<vmem>>, %arg7: memref<1x3xf32, #tpu.memory_space<vmem>>, %arg8: memref<8x3xf32, #tpu.memory_space<vmem>>) attributes {dimension_semantics = [#tpu.dimension_semantics<parallel>], iteration_bounds = array<i64: 1>, scalar_prefetch = 0 : i64, scratch_operands = 0 : i64, tpu.core_type = #tpu.core_type<tc>, window_params = [{transform_indices = @transform_0, window_bounds = array<i64: 8, 4>}, {pipeline_mode = #tpu.pipeline_mode<synchronous>, transform_indices = @transform_1, window_bounds = array<i64: 4, 25>}, {pipeline_mode = #tpu.pipeline_mode<synchronous>, transform_indices = @transform_2, window_bounds = array<i64: 1, 25>}, {pipeline_mode = #tpu.pipeline_mode<synchronous>, transform_indices = @transform_3, window_bounds = array<i64: 25, 30>}, {pipeline_mode = #tpu.pipeline_mode<synchronous>, transform_indices = @transform_4, window_bounds = array<i64: 1, 30>}, {pipeline_mode = #tpu.pipeline_mode<synchronous>, transform_indices = @transform_5, window_bounds = array<i64: 30, 3>}, {pipeline_mode = #tpu.pipeline_mode<synchronous>, transform_indices = @transform_6, window_bounds = array<i64: 1, 3>}, {transform_indices = @transform_7, window_bounds = array<i64: 8, 3>}]} {
    %c0 = arith.constant 0 : index
    %c0_0 = arith.constant 0 : index
    %0 = vector.load %arg2[%c0, %c0_0] : memref<4x25xf32, #tpu.memory_space<vmem>>, vector<4x25xf32>
    %c0_1 = arith.constant 0 : index
    %c0_2 = arith.constant 0 : index
    %1 = vector.load %arg3[%c0_1, %c0_2] : memref<1x25xf32, #tpu.memory_space<vmem>>, vector<1x25xf32>
    %c0_3 = arith.constant 0 : index
    %c0_4 = arith.constant 0 : index
    %2 = vector.load %arg4[%c0_3, %c0_4] : memref<25x30xf32, #tpu.memory_space<vmem>>, vector<25x30xf32>
    %c0_5 = arith.constant 0 : index
    %c0_6 = arith.constant 0 : index
    %3 = vector.load %arg5[%c0_5, %c0_6] : memref<1x30xf32, #tpu.memory_space<vmem>>, vector<1x30xf32>
    %c0_7 = arith.constant 0 : index
    %c0_8 = arith.constant 0 : index
    %4 = vector.load %arg6[%c0_7, %c0_8] : memref<30x3xf32, #tpu.memory_space<vmem>>, vector<30x3xf32>
    %c0_9 = arith.constant 0 : index
    %c0_10 = arith.constant 0 : index
    %5 = vector.load %arg7[%c0_9, %c0_10] : memref<1x3xf32, #tpu.memory_space<vmem>>, vector<1x3xf32>
    %c0_i32 = arith.constant 0 : i32
    %6 = tpu.assume_multiple %c0_i32, 8 : i32
    %7 = arith.index_cast %6 : i32 to index
    %c0_11 = arith.constant 0 : index
    %8 = vector.load %arg1[%7, %c0_11] : memref<8x4xf32, #tpu.memory_space<vmem>>, vector<8x4xf32>
    %cst = arith.constant dense<0.000000e+00> : vector<8x25xf32>
    %9 = tpu.matmul %8, %0, %cst {dimension_numbers = #tpu.dot_dimension_numbers<[1], [0], [0], [1], [0, 0, 1, 1], [], []>} : vector<8x4xf32>, vector<4x25xf32>, vector<8x25xf32> -> vector<8x25xf32>
    %10 = vector.broadcast %1 : vector<1x25xf32> to vector<8x25xf32>
    %11 = arith.addf %9, %10 : vector<8x25xf32>
    %cst_12 = arith.constant 0.000000e+00 : f32
    %12 = vector.broadcast %cst_12 : f32 to vector<8x25xf32>
    %13 = arith.maximumf %11, %12 : vector<8x25xf32>
    %cst_13 = arith.constant dense<0.000000e+00> : vector<8x30xf32>
    %14 = tpu.matmul %13, %2, %cst_13 {dimension_numbers = #tpu.dot_dimension_numbers<[1], [0], [0], [1], [0, 0, 1, 1], [], []>} : vector<8x25xf32>, vector<25x30xf32>, vector<8x30xf32> -> vector<8x30xf32>
    %15 = vector.broadcast %3 : vector<1x30xf32> to vector<8x30xf32>
    %16 = arith.addf %14, %15 : vector<8x30xf32>
    %cst_14 = arith.constant 0.000000e+00 : f32
    %17 = vector.broadcast %cst_14 : f32 to vector<8x30xf32>
    %18 = arith.maximumf %16, %17 : vector<8x30xf32>
    %cst_15 = arith.constant dense<0.000000e+00> : vector<8x3xf32>
    %19 = tpu.matmul %18, %4, %cst_15 {dimension_numbers = #tpu.dot_dimension_numbers<[1], [0], [0], [1], [0, 0, 1, 1], [], []>} : vector<8x30xf32>, vector<30x3xf32>, vector<8x3xf32> -> vector<8x3xf32>
    %20 = vector.broadcast %5 : vector<1x3xf32> to vector<8x3xf32>
    %21 = arith.addf %19, %20 : vector<8x3xf32>
    %22 = arith.index_cast %6 : i32 to index
    %c0_16 = arith.constant 0 : index
    %23 = vector.load %arg8[%22, %c0_16] : memref<8x3xf32, #tpu.memory_space<vmem>>, vector<8x3xf32>
    tpu.vector_store %arg8[%22, %c0_16], %21 {strides = array<i32>} : memref<8x3xf32, #tpu.memory_space<vmem>>, vector<8x3xf32>,
    return
  }
  func.func @transform_0(%arg0: i32) -> (i32, i32) {
    %c0_i32 = arith.constant 0 : i32
    %c0_i32_0 = arith.constant 0 : i32
    return %arg0, %c0_i32 : i32, i32
  }
  func.func @transform_1(%arg0: i32) -> (i32, i32) {
    %c0_i32 = arith.constant 0 : i32
    %c0_i32_0 = arith.constant 0 : i32
    %c0_i32_1 = arith.constant 0 : i32
    return %c0_i32, %c0_i32_0 : i32, i32
  }
  func.func @transform_2(%arg0: i32) -> (i32, i32) {
    %c0_i32 = arith.constant 0 : i32
    %c0_i32_0 = arith.constant 0 : i32
    %c0_i32_1 = arith.constant 0 : i32
    return %c0_i32, %c0_i32_0 : i32, i32
  }
  func.func @transform_3(%arg0: i32) -> (i32, i32) {
    %c0_i32 = arith.constant 0 : i32
    %c0_i32_0 = arith.constant 0 : i32
    %c0_i32_1 = arith.constant 0 : i32
    return %c0_i32, %c0_i32_0 : i32, i32
  }
  func.func @transform_4(%arg0: i32) -> (i32, i32) {
    %c0_i32 = arith.constant 0 : i32
    %c0_i32_0 = arith.constant 0 : i32
    %c0_i32_1 = arith.constant 0 : i32
    return %c0_i32, %c0_i32_0 : i32, i32
  }
  func.func @transform_5(%arg0: i32) -> (i32, i32) {
    %c0_i32 = arith.constant 0 : i32
    %c0_i32_0 = arith.constant 0 : i32
    %c0_i32_1 = arith.constant 0 : i32
    return %c0_i32, %c0_i32_0 : i32, i32
  }
  func.func @transform_6(%arg0: i32) -> (i32, i32) {
    %c0_i32 = arith.constant 0 : i32
    %c0_i32_0 = arith.constant 0 : i32
    %c0_i32_1 = arith.constant 0 : i32
    return %c0_i32, %c0_i32_0 : i32, i32
  }
  func.func @transform_7(%arg0: i32) -> (i32, i32) {
    %c0_i32 = arith.constant 0 : i32
    %c0_i32_0 = arith.constant 0 : i32
    return %arg0, %c0_i32 : i32, i32
  }
}

</mosaic_0001>

<bundles_post_ra>
// kernel: mlp_forward.1
= control target key start
LH: loop header
LB: loop body
LE: loop exit
PB: predicated region body
PF: predicated region fallthrough
CT: control target
= control target key end

     0   :  { %vm49_vm0 = vcmask 1043456   ;;  %vm45_vm1 = vcmask 31744   ;;  %v365_v0 = vmov 0.0   ;;  %vm366_vm2 = vmmov 0   ;;  %s453_s1 = inlined_call_operand.vmem [shape: f32[4,25], index: 1, kind: input, shape index: {}]   ;;  %s454_s0 = inlined_call_operand.vmem [shape: f32[8,4], index: 0, kind: input, shape index: {}]   ;;  %s455_s3 = inlined_call_operand.vmem [shape: f32[25,30], index: 3, kind: input, shape index: {}]   ;;  %s456_s5 = inlined_call_operand.vmem [shape: f32[30,3], index: 5, kind: input, shape index: {}]   ;;  %s457_s2 = inlined_call_operand.vmem [shape: f32[1,25], index: 2, kind: input, shape index: {}]   ;;  %s458_s4 = inlined_call_operand.vmem [shape: f32[1,30], index: 4, kind: input, shape index: {}]   ;;  %s459_s6 = inlined_call_operand.vmem [shape: f32[1,3], index: 6, kind: input, shape index: {}]   ;;  %s460_s7 = inlined_call_operand.vmem [shape: f32[8,3], index: 7, kind: output, shape index: {}]  }
   0x1   :  { %320 = vmatprep.subr.mxu0 %v365_v0  ;;  %v26_v1 = vld [vmem:[%s453_s1] sm:$0xf]  ;;  %322 = vmatprep.mubr.msk.f32.mxu0 %vm366_vm2, %v365_v0  ;;  %v367_v4 = vmov 0.0|0.0   ;;  %v29_v5 = vld [vmem:[%s455_s3 + $0x8] sm:$0xff]  ;;  %v30_v7 = vld [vmem:[%s455_s3 + $0x10] sm:$0xff]  ;;  %vm134_vm3 = vcmask 1040384  }
   0x2   :  { %v38_v2 = vld [vmem:[%s454_s0] sm:$0xff]  ;;  %321 = vmatpush3.msk.msra.mxu0 %vm49_vm0, %v26_v1  ;;  %347 = vmatprep.subr.bf16.mxu1 %v367_v4  ;;  %v31_v8 = vld [vmem:[%s455_s3 + $0x18] sm:$0x1]  ;;  %vm368_vm4 = vmmov 1   ;;  %v34_v11 = vld [vmem:[%s456_s5 + $0x8] sm:$0xff]  ;;  %vm130_vm6 = vcmask 203776  }
   0x3   :  { %v28_v3 = vld [vmem:[%s455_s3] sm:$0xff]  ;;  %323 = vmatmul.mubr.msk.f32.vlgmr.msra.gmra.mrb[0].mxu0 %vm45_vm1, %v38_v2  ;;  %333 = vmatprep.mubr.msk.f32.mxu1 %vm366_vm2, %v365_v0  ;;  %v351_v9 = vpack.c.bf16 %v31_v8, %v30_v7  ;;  %vm352_vm5 = vmpackc.low %vm134_vm3, %vm368_vm4  ;;  %vm219_vm7 = vcmask 1045504   ;;  %v35_v18 = vld [vmem:[%s456_s5 + $0x10] sm:$0xff]  ;;  %vm215_vm9 = vcmask 244736   ;;  %vm293_vm10 = vcmask 23552  }
   0x4   :  { %v348_v6 = vpack.c.bf16 %v29_v5, %v28_v3  ;;  %354 = vmatprep.subr.bf16.mxu0 %v367_v4  ;;  %344 = vmatprep.mubr.msk.f32.mxu0 %vm366_vm2, %v365_v0  ;;  %v33_v10 = vld [vmem:[%s456_s5] sm:$0xff]  ;;  %vm359_vm8 = vmpackc.low %vm219_vm7, %vm368_vm4  ;;  %v36_v19 = vld [vmem:[%s456_s5 + $0x18] sm:$0x3f] }
   0x5   :  { %v355_v12 = vpack.c.bf16 %v34_v11, %v33_v10  ;;  %v299_v13 = vld [vmem:[%s457_s2] ss:$0 sm:$0xff]  ;;  %v358_v20 = vpack.c.bf16 %v36_v19, %v35_v18 }
   0x6   :  { %349 = vmatpush3.bf16.msra.mxu1 %v348_v6  ;;  %v302_v21 = vld [vmem:[%s458_s4] ss:$0 sm:$0xff] }
   0x7   :  { %350 = vmatprep.subr.bf16.mxu1 %v367_v4  ;;  %356 = vmatpush3.bf16.msra.mxu0 %v355_v12  ;;  %v305_v26 = vld [vmem:[%s459_s6] ss:$0 sm:$0xff] }
   0x8   :  { %357 = vmatprep.subr.bf16.mxu0 %v367_v4 }
   0xa   :  { %353 = vmatpush3.bf16.msk.msra.mxu1 %vm352_vm5, %v351_v9 }
   0xb   :  { %360 = vmatpush3.bf16.msk.msra.mxu0 %vm359_vm8, %v358_v20 }
  0xd6   :  { %v119_v14 = vpop.f32.mrb[0].mxu0 }
  0xd7   :  { %v120_v15 = vadd.f32 %v299_v13, %v119_v14  ;;  %v324_v16 = vpop.f32.mrb[1].mxu0 }
  0xd9   :  { %v123_v17 = vmax.f32 %v120_v15, 0.0 }
  0xdb   :  { %334 = vmatmul.mubr.msk.f32.vlgmr.msra.gmra.mrb[0].mxu1 %vm130_vm6, %v123_v17 }
 0x1ae   :  { %v204_v22 = vpop.f32.mrb[0].mxu1 }
 0x1af   :  { %v205_v23 = vadd.f32 %v302_v21, %v204_v22  ;;  %v335_v24 = vpop.f32.mrb[1].mxu1 }
 0x1b1   :  { %v208_v25 = vmax.f32 %v205_v23, 0.0 }
 0x1b3   :  { %345 = vmatmul.mubr.msk.f32.vlgmr.msra.gmra.mrb[2].mxu0 %vm215_vm9, %v208_v25 }
 0x286   :  { %v289_v27 = vpop.f32.mrb[2].mxu0 }
 0x287   :  { %v290_v28 = vadd.f32 %v305_v26, %v289_v27  ;;  %v346_v29 = vpop.f32.mrb[3].mxu0 }
 0x289   :  { %294 = vst.msk [vmem:[%s460_s7] sm:$0xff] %vm293_vm10, %v290_v28 }

</bundles_post_ra>
